<compile_context>
chip_gen: v7x
topology: tpu7x:2x2x1
jax: 0.10.0
libtpu: 0.0.40
codegen_flags: <defaults>
</compile_context>

<pallas_src>
import functools

import jax
import jax.numpy as jnp
from jax.experimental import pallas as pl
from jax.experimental.pallas import tpu as pltpu


def _round_up(x, m):
    return (x + m - 1) // m * m


def _fc_block_kernel(*refs, training):
    if training:
        x_ref, w_ref, b_ref, mask_ref, o_ref, acc_ref = refs
    else:
        x_ref, w_ref, b_ref, o_ref, acc_ref = refs
        mask_ref = None

    k = pl.program_id(2)

    @pl.when(k == 0)
    def _():
        acc_ref[...] = jnp.zeros_like(acc_ref)

    # x_ref: (tm, tk), w_ref: (tn, tk) in PyTorch (N, K) layout.
    # Contract on K (axis 1 of both) -> (tm, tn), f32 accumulation on the MXU.
    acc_ref[...] += jax.lax.dot_general(
        x_ref[...], w_ref[...],
        dimension_numbers=(((1,), (1,)), ((), ())),
        preferred_element_type=jnp.float32)

    @pl.when(k == pl.num_programs(2) - 1)
    def _():
        y = acc_ref[...] + b_ref[...]          # bias broadcast over batch
        y = jnp.maximum(y, 0.0)                # ReLU
        if training:
            y = y * mask_ref[...]              # inverted dropout: mask in {0, 2}
        o_ref[...] = y.astype(o_ref.dtype)


def fc_block(x, weight, bias, *, flatten=True, training=False, rng_key=None,
             tn=128, tk=512):
    """Forward pass of FcBlock.

    x:      (B, C, H, W) if flatten else (B, K), float32
    weight: (N, K) -- PyTorch nn.Linear layout (out_features, in_features)
    bias:   (N,)
    returns (B, N) float32
    """
    x2d = x.reshape(x.shape[0], -1) if flatten else x
    B, K = x2d.shape
    N = weight.shape[0]

    # Tile sizes: sublane-aligned M tile, lane-dense (>=128) N tile, and a K
    # tile sized so double-buffered f32 input tiles stay far under every
    # generation's scoped-VMEM budget (v5e 16 MiB default, v7x 64 MiB physical).
    tm = min(128, _round_up(B, 8))
    tn = min(tn, _round_up(N, 128))
    tk = min(tk, _round_up(K, 128))

    Bp = _round_up(B, tm)
    Np = _round_up(N, tn)
    Kp = _round_up(K, tk)

    # Zero-pad to lane/sublane-dense shapes: padded K contributes 0 to the dot,
    # padded rows/cols of the output are sliced off below.
    xp = jnp.pad(x2d.astype(jnp.float32), ((0, Bp - B), (0, Kp - K)))
    wp = jnp.pad(weight.astype(jnp.float32), ((0, Np - N), (0, Kp - K)))
    bp = jnp.pad(bias.astype(jnp.float32), (0, Np - N)).reshape(1, Np)

    grid = (Bp // tm, Np // tn, Kp // tk)

    in_specs = [
        pl.BlockSpec((tm, tk), lambda i, j, k: (i, k)),   # x tile
        pl.BlockSpec((tn, tk), lambda i, j, k: (j, k)),   # weight tile (N, K)
        pl.BlockSpec((1, tn), lambda i, j, k: (0, j)),    # bias tile
    ]
    operands = [xp, wp, bp]

    if training:
        if rng_key is None:
            rng_key = jax.random.PRNGKey(0)
        keep = jax.random.bernoulli(rng_key, 0.5, (Bp, Np))
        scale = keep.astype(jnp.float32) * 2.0            # 1/(1-p), p = 0.5
        in_specs.append(pl.BlockSpec((tm, tn), lambda i, j, k: (i, j)))
        operands.append(scale)

    kernel = functools.partial(_fc_block_kernel, training=training)

    out = pl.pallas_call(
        kernel,
        out_shape=jax.ShapeDtypeStruct((Bp, Np), jnp.float32),
        grid_spec=pltpu.PrefetchScalarGridSpec(
            num_scalar_prefetch=0,
            grid=grid,
            in_specs=in_specs,
            out_specs=pl.BlockSpec((tm, tn), lambda i, j, k: (i, j)),
            scratch_shapes=[pltpu.VMEM((tm, tn), jnp.float32)],
        ),
        compiler_params=pltpu.CompilerParams(
            dimension_semantics=("parallel", "parallel", "arbitrary"),
            vmem_limit_bytes=32 * 1024 * 1024,
        ),
    )(*operands)

    return out[:B, :N]


if __name__ == "__main__":
    # Shapes consistent with the module: input (2, 4, 16, 16),
    # fc_params = (4*16*16, 32), flatten=True.
    B, C, H, W = 2, 4, 16, 16
    input_size = C * H * W      # 1024
    output_size = 32

    key = jax.random.PRNGKey(0)
    kx, kw, kb, kd = jax.random.split(key, 4)

    x = jax.random.normal(kx, (B, C, H, W), dtype=jnp.float32)

    # Deterministic params mimicking nn.Linear's uniform(-1/sqrt(K), 1/sqrt(K)).
    bound = 1.0 / (input_size ** 0.5)
    weight = jax.random.uniform(kw, (output_size, input_size),
                                minval=-bound, maxval=bound, dtype=jnp.float32)
    bias = jax.random.uniform(kb, (output_size,),
                              minval=-bound, maxval=bound, dtype=jnp.float32)

    # Eval-mode forward (Dropout is identity, matching module.eval()).
    out = jax.block_until_ready(
        fc_block(x, weight, bias, flatten=True, training=False))
    ref = jnp.maximum(x.reshape(B, -1) @ weight.T + bias, 0.0)
    assert out.shape == (B, output_size)
    assert jnp.allclose(out, ref, atol=1e-5, rtol=1e-5), "mismatch vs reference"

    # Training-mode forward: inverted Dropout(0.5).  Every element is either
    # dropped (0) or the eval activation scaled by 2.
    out_train = jax.block_until_ready(
        fc_block(x, weight, bias, flatten=True, training=True, rng_key=kd))
    assert out_train.shape == (B, output_size)
    assert bool(jnp.all((out_train == 0.0)
                        | jnp.isclose(out_train, 2.0 * ref,
                                      atol=1e-5, rtol=1e-5))), "dropout mismatch"

    print("KERNEL_OK")
</pallas_src>

<mosaic_0001>
module attributes {stable_mosaic.version = 11 : i64} {
  func.func @_fc_block_kernel(%arg0: i32, %arg1: i32, %arg2: i32, %arg3: memref<8x512xf32, #tpu.memory_space<vmem>>, %arg4: memref<128x512xf32, #tpu.memory_space<vmem>>, %arg5: memref<1x128xf32, #tpu.memory_space<vmem>>, %arg6: memref<8x128xf32, #tpu.memory_space<vmem>>, %arg7: memref<8x128xf32, #tpu.memory_space<vmem>>) attributes {dimension_semantics = [#tpu.dimension_semantics<parallel>, #tpu.dimension_semantics<parallel>, #tpu.dimension_semantics<arbitrary>], iteration_bounds = array<i64: 1, 1, 2>, scalar_prefetch = 0 : i64, scratch_operands = 1 : i64, tpu.core_type = #tpu.core_type<tc>, window_params = [{transform_indices = @transform_0, window_bounds = array<i64: 8, 512>}, {transform_indices = @transform_1, window_bounds = array<i64: 128, 512>}, {transform_indices = @transform_2, window_bounds = array<i64: 1, 128>}, {transform_indices = @transform_3, window_bounds = array<i64: 8, 128>}]} {
    %c0_i32 = arith.constant 0 : i32
    %0 = arith.cmpi eq, %arg2, %c0_i32 : i32
    %1 = arith.extui %0 : i1 to i32
    %c0_i32_0 = arith.constant 0 : i32
    %2 = arith.cmpi ne, %1, %c0_i32_0 : i32
    scf.if %2 {
      %cst_9 = arith.constant 0.000000e+00 : f32
      %12 = vector.broadcast %cst_9 : f32 to vector<8x128xf32>
      %c0_10 = arith.constant 0 : index
      %c0_11 = arith.constant 0 : index
      %13 = vector.load %arg7[%c0_10, %c0_11] : memref<8x128xf32, #tpu.memory_space<vmem>>, vector<8x128xf32>
      tpu.vector_store %arg7[%c0_10, %c0_11], %12 {strides = array<i32>} : memref<8x128xf32, #tpu.memory_space<vmem>>, vector<8x128xf32>,
    } else {
    }
    %c0 = arith.constant 0 : index
    %c0_1 = arith.constant 0 : index
    %3 = vector.load %arg7[%c0, %c0_1] : memref<8x128xf32, #tpu.memory_space<vmem>>, vector<8x128xf32>
    %c0_2 = arith.constant 0 : index
    %c0_3 = arith.constant 0 : index
    %4 = vector.load %arg3[%c0_2, %c0_3] : memref<8x512xf32, #tpu.memory_space<vmem>>, vector<8x512xf32>
    %c0_4 = arith.constant 0 : index
    %c0_5 = arith.constant 0 : index
    %5 = vector.load %arg4[%c0_4, %c0_5] : memref<128x512xf32, #tpu.memory_space<vmem>>, vector<128x512xf32>
    %cst = arith.constant dense<0.000000e+00> : vector<8x128xf32>
    %6 = tpu.matmul %4, %5, %cst {dimension_numbers = #tpu.dot_dimension_numbers<[1], [1], [0], [0], [0, 0, 1, 0], [], []>} : vector<8x512xf32>, vector<128x512xf32>, vector<8x128xf32> -> vector<8x128xf32>
    %7 = arith.addf %3, %6 : vector<8x128xf32>
    %c0_6 = arith.constant 0 : index
    %c0_7 = arith.constant 0 : index
    %8 = vector.load %arg7[%c0_6, %c0_7] : memref<8x128xf32, #tpu.memory_space<vmem>>, vector<8x128xf32>
    tpu.vector_store %arg7[%c0_6, %c0_7], %7 {strides = array<i32>} : memref<8x128xf32, #tpu.memory_space<vmem>>, vector<8x128xf32>,
    %c1_i32 = arith.constant 1 : i32
    %9 = arith.cmpi eq, %arg2, %c1_i32 : i32
    %10 = arith.extui %9 : i1 to i32
    %c0_i32_8 = arith.constant 0 : i32
    %11 = arith.cmpi ne, %10, %c0_i32_8 : i32
    scf.if %11 {
      %c0_9 = arith.constant 0 : index
      %c0_10 = arith.constant 0 : index
      %12 = vector.load %arg7[%c0_9, %c0_10] : memref<8x128xf32, #tpu.memory_space<vmem>>, vector<8x128xf32>
      %c0_11 = arith.constant 0 : index
      %c0_12 = arith.constant 0 : index
      %13 = vector.load %arg5[%c0_11, %c0_12] : memref<1x128xf32, #tpu.memory_space<vmem>>, vector<1x128xf32>
      %14 = vector.broadcast %13 : vector<1x128xf32> to vector<8x128xf32>
      %15 = arith.addf %12, %14 : vector<8x128xf32>
      %cst_13 = arith.constant 0.000000e+00 : f32
      %16 = vector.broadcast %cst_13 : f32 to vector<8x128xf32>
      %17 = arith.maximumf %15, %16 : vector<8x128xf32>
      %c0_14 = arith.constant 0 : index
      %c0_15 = arith.constant 0 : index
      %18 = vector.load %arg6[%c0_14, %c0_15] : memref<8x128xf32, #tpu.memory_space<vmem>>, vector<8x128xf32>
      tpu.vector_store %arg6[%c0_14, %c0_15], %17 {strides = array<i32>} : memref<8x128xf32, #tpu.memory_space<vmem>>, vector<8x128xf32>,
    } else {
    }
    return
  }
  func.func @transform_0(%arg0: i32, %arg1: i32, %arg2: i32) -> (i32, i32) {
    %c0_i32 = arith.constant 0 : i32
    return %arg0, %arg2 : i32, i32
  }
  func.func @transform_1(%arg0: i32, %arg1: i32, %arg2: i32) -> (i32, i32) {
    %c0_i32 = arith.constant 0 : i32
    return %arg1, %arg2 : i32, i32
  }
  func.func @transform_2(%arg0: i32, %arg1: i32, %arg2: i32) -> (i32, i32) {
    %c0_i32 = arith.constant 0 : i32
    %c0_i32_0 = arith.constant 0 : i32
    return %c0_i32, %arg1 : i32, i32
  }
  func.func @transform_3(%arg0: i32, %arg1: i32, %arg2: i32) -> (i32, i32) {
    %c0_i32 = arith.constant 0 : i32
    return %arg0, %arg1 : i32, i32
  }
}

</mosaic_0001>

<bundles_post_ra>
// kernel: tpu_custom_call.1
= control target key start
LH: loop header
LB: loop body
LE: loop exit
PB: predicated region body
PF: predicated region fallthrough
CT: control target
= control target key end

     0   :  { %8 = vsyncpa [#allocation4], 0  ;;  %s1221_s0 = inlined_call_operand.hbm [shape: f32[8,1024], index: 0, kind: input, shape index: {}]   ;;  %s1222_s1 = inlined_call_operand.hbm [shape: f32[128,1024], index: 1, kind: input, shape index: {}]   ;;  %s1223_s2 = inlined_call_operand.vmem [shape: f32[1,128], index: 2, kind: input, shape index: {}]   ;;  %s1224_s3 = inlined_call_operand.hbm [shape: f32[8,128], index: 3, kind: output, shape index: {}]  }
   0x1   :  { %10 = vsyncpa [#allocation4 + $0x1], 0 }
   0x2   :  { %11 = vsyncpa [#allocation7], 0 }
   0x3   :  { %13 = vsyncpa [#allocation7 + $0x1], 0 }
   0x4   :  { %14 = vsyncpa [#allocation5], 0  ;;  %s944_s12 = smov 0   ;;  %s946_s13 = smov 0  }
   0x5   :  { %s948_s14 = smov 0   ;;  %s950_s15 = smov 0  }
   0x6   :  { %s952_s16 = smov 0   ;;  %s954_s17 = smov 0  }
   0x7 LB: > { %s614_s18 = sadd.s32 4294967295, %s915_s17   ;;  %s32_s19 = sadd.s32 1, %s911_s16  ;;  %s915_s17 = sphi %s954_s17, %s20_s17   ;;  %s911_s16 = sphi %s952_s16, %s1236_s16   ;;  %s907_s15 = sphi %s950_s15, %s1235_s15   ;;  %s903_s14 = sphi %s948_s14, %s1234_s14   ;;  %s899_s13 = sphi %s946_s13, %s1233_s13   ;;  %s895_s12 = sphi %s944_s12, %s1232_s12  }
   0x8   : > { %p33_p0 = scmp.ge.s32.totalorder %s32_s19, 2  ;;  %s48_s20 = sadd.s32 1, %s903_s14 }
   0x9   : > { %p55_p1 = scmp.ne.s32.totalorder %s903_s14, %s899_s13  ;;  %p56_p2 = scmp.eq.s32.totalorder %s915_s17, 0 }
   0xa   : > { %s1238_s19 = smov (%p33_p0, %s32_s19), 0  ;;  %p61_p4 = scmp.ne.s32.totalorder %s899_s13, %s895_s12 }
   0xb   : > { %p980_p3 = por %p56_p2, %p55_p1  ;;  %s44_s22 = ssub.s32 %s911_s16, %s1238_s19 }
   0xc   : > { %p62_p5 = scmp.eq.s32.totalorder %s614_s18, 0  ;;  %p46_p6 = scmp.eq.s32.totalorder %s44_s22, 0 }
   0xd   : > { %p715_p8 = scmp.lt.s32.totalorder %s915_s17, 2  ;;  %s998_s25 = sand.u32 1, %s903_s14  }
   0xe   : > { %p989_p7 = por %p62_p5, %p61_p4  ;;  %s634_s26 = sshll.u32 %s911_s16, 9 }
   0xf   : > { %s995_s24 = scalar_select %p46_p6, %s903_s14, %s48_s20  }
  0x10   : > { %s1227_s23 = scalar_select %p989_p7, 1, 0 }
  0x11   : > { %s618_s27 = sshll.u32 %s998_s25, 5  ;;  %s1007_s30 = scalar_lea.hbm %s1221_s0, %s634_s26 }
  0x12   : > { %s177_s4 = scalar_lea.vmem [#allocation3], %s618_s27  ;;  %p1011_p9 = pnand %p715_p8, %p980_p3 }
  0x13   : > { %s187_s5 = sshll.u32 %s177_s4, 4  ;;  %s621_s7 = sshll.u32 %s998_s25, 9  ;;  %s1015_s5 = int_to_ptr.vmem [resolvable:$true] %s187_s5 }
  0x14   : > { %s174_s8 = scalar_lea.sflag [#allocation4], %s998_s25  ;;  %s771_s9 = scalar_lea.hbm %s1007_s30, 512 }
  0x15   : > { %p772_p10 = scmp.ne.s32.totalorder %s1007_s30, %s771_s9  ;;  %p773_p11 = pneg %p1011_p9 }
  0x16   : > { %s776_s12 = scalar_lea.hbm %s1221_s0, 1024  ;;  %p777_p0 = scmp.lt.u32.totalorder %s1007_s30, %s1221_s0 }
  0x17   : > { %p774_p12 = pnand %p773_p11, %p772_p10  ;;  %p778_p1 = scmp.lt.u32.totalorder %s776_s12, %s771_s9 }
  0x18   : > { %p780_p3 = scmp.lt.u32.totalorder %s771_s9, %s1007_s30 }
  0x19   : > { %p775_p13 = pneg %p774_p12  ;;  %p779_p2 = por %p778_p1, %p777_p0 }
  0x1b   : > { %p781_p4 = por %p780_p3, %p779_p2 }
  0x1d   : > { %p782_p5 = pnand %p781_p4, %p775_p13 }
  0x1f   : > { %785 = shalt.err (!%p782_p5)
}
  0x20   : > { %s786_s22 = scalar_lea.vmem %s1015_s5, 512  ;;  %s917_s27 = smov [#allocation3]  }
  0x21   : > { %p787_p6 = scmp.ne.s32.totalorder %s1015_s5, %s786_s22  ;;  %s791_s28 = sshll.u32 %s917_s27, 4  ;;  %s792_s28 = int_to_ptr.vmem [resolvable:$false] %s791_s28 }
  0x22   : > { %s793_s29 = scalar_lea.vmem %s792_s28, 1024  ;;  %p794_p12 = scmp.lt.s32.totalorder %s1015_s5, %s792_s28 }
  0x23   : > { %p789_p8 = pnand %p787_p6, %p773_p11  ;;  %p795_p0 = scmp.lt.s32.totalorder %s793_s29, %s786_s22 }
  0x25   : > { %p790_p10 = pneg %p789_p8  ;;  %p796_p1 = por %p795_p0, %p794_p12 }
  0x27   : > { %p797_p2 = pnand %p796_p1, %p790_p10 }
  0x29   : > { %800 = shalt.err (!%p797_p2)
}
  0x2a   : > { %711 = dma.hbm_to_vmem [thread:$0]  (!%p1011_p9), %s1007_s30, 512, %s1015_s5, %s174_s8  }
  0x2b   : > { %s1049_s10 = scalar_lea.hbm %s1222_s1, %s634_s26  ;;  %p624_p13 = scmp.ge.s32.totalorder %s915_s17, 1 }
  0x2c   : > { %p216_p3 = scmp.lt.s32.totalorder %s915_s17, 3  ;;  %s198_s11 = scalar_lea.vmem [#allocation6], %s621_s7 }
  0x2d   : > { %s208_s12 = sshll.u32 %s198_s11, 4  ;;  %s195_s30 = scalar_lea.sflag [#allocation7], %s998_s25  ;;  %s1059_s12 = int_to_ptr.vmem [resolvable:$true] %s208_s12 }
  0x2e   : > { %p1055_p4 = pnand %p624_p13, %p216_p3  ;;  %s801_s5 = scalar_lea.hbm %s1049_s10, 8192 }
  0x2f   : > { %p802_p5 = scmp.ne.s32.totalorder %s1049_s10, %s801_s5  ;;  %s806_s21 = scalar_lea.hbm %s1222_s1, 16384 }
  0x30   : > { %p807_p10 = scmp.lt.u32.totalorder %s1049_s10, %s1222_s1  ;;  %p808_p12 = scmp.lt.u32.totalorder %s806_s21, %s801_s5 }
  0x31   : > { %p804_p6 = pnand %p802_p5, %p773_p11  ;;  %p810_p1 = scmp.lt.u32.totalorder %s801_s5, %s1049_s10 }
  0x32   : > { %p809_p0 = por %p808_p12, %p807_p10 }
  0x33   : > { %p805_p8 = pneg %p804_p6 }
  0x34   : > { %p811_p2 = por %p810_p1, %p809_p0 }
  0x36   : > { %p812_p13 = pnand %p811_p2, %p805_p8 }
  0x38   : > { %815 = shalt.err (!%p812_p13)
}
  0x39   : > { %s816_s27 = scalar_lea.vmem %s1059_s12, 8192  ;;  %s918_s28 = smov [#allocation6]  }
  0x3a   : > { %p817_p3 = scmp.ne.s32.totalorder %s1059_s12, %s816_s27  ;;  %s821_s29 = sshll.u32 %s918_s28, 4  ;;  %s822_s29 = int_to_ptr.vmem [resolvable:$false] %s821_s29 }
  0x3b   : > { %s823_s4 = scalar_lea.vmem %s822_s29, 16384  ;;  %p824_p7 = scmp.lt.s32.totalorder %s1059_s12, %s822_s29 }
  0x3c   : > { %p819_p5 = pnand %p817_p3, %p773_p11  ;;  %p825_p10 = scmp.lt.s32.totalorder %s823_s4, %s816_s27 }
  0x3e   : > { %p820_p6 = pneg %p819_p5  ;;  %p826_p12 = por %p825_p10, %p824_p7 }
  0x40   : > { %p827_p0 = pnand %p826_p12, %p820_p6 }
  0x42   : > { %830 = shalt.err (!%p827_p0)
}
  0x43   : > { %s919_s9 = smov 1024   ;;  %s920_s11 = smov 512  }
  0x44   : > { %s921_s5 = smov 32   ;;  %220 = sbr.rel (%p1055_p4) target bundleno = 411 (0x19b), region = 32 }
  0x45   : > { %714 = dma.hbm_to_vmem [thread:$0]  (!%p1011_p9), %s1049_s10, 8192, %s1059_s12, %s195_s30, %s919_s9, %s920_s11, %s921_s5  }
  0x46   : > { %s222_s26 = sand.u32 (!%p1055_p4), 1, %s899_s13   ;;  %p1230_p7 = scmp.ne.s32.totalorder (!%p1055_p4), %s1227_s23, 0 }
  0x47   : > { %s625_s8 = sshll.u32 (!%p1055_p4), %s222_s26, 5  ;;  %s223_s21 = scalar_lea.sflag (!%p1055_p4), [#allocation4], %s222_s26 }
  0x48   : > { %s1090_s22 = scalar_lea.vmem (!%p1055_p4), [#allocation3], %s625_s8 }
  0x4b   : > { %882 = dma.done.wait (%p1230_p7), %s223_s21, 512  }
  0x4c   : > { %884 = vsyncadd (%p1230_p7), %s223_s21, 4294966784  ;;  %s626_s7 = sshll.u32 %s222_s26, 9  ;;  %s232_s6 = scalar_lea.sflag [#allocation7], %s222_s26 }
  0x4d   : > { %s1096_s25 = scalar_lea.vmem [#allocation6], %s626_s7 }
  0x4e   : > { %886 = dma.done.wait (%p1230_p7), %s232_s6, 8192  }
  0x4f   : > { %888 = vsyncadd (%p1230_p7), %s232_s6, 4294959104  ;;  %p627_p9 = scmp.ne.s32.totalorder %s907_s15, 0 }
  0x50   : > { %v922_v0 = vmov (!%p627_p9), 0.0  }
  0x51   : > { %270 = sbr.rel (%p627_p9) target bundleno = 88 (0x58), region = 44  ;;  %271 = vst [vmem:[#allocation2] sm:$0xff] (!%p627_p9), %v922_v0 }
  0x58 PF: > { %v278_v1 = vld [vmem:[%s1096_s25 + $0x8] sm:$0xff]  ;;  %v280_v3 = vld [vmem:[%s1096_s25 + $0x18] sm:$0xff]  ;;  %v277_v6 = vld [vmem:[%s1096_s25] sm:$0xff]  ;;  %p628_p11 = scmp.ne.s32.totalorder %s907_s15, 1 }
  0x59   : > { %v282_v2 = vld [vmem:[%s1096_s25 + $0x28] sm:$0xff]  ;;  %v284_v5 = vld [vmem:[%s1096_s25 + $0x38] sm:$0xff]  ;;  %v281_v7 = vld [vmem:[%s1096_s25 + $0x20] sm:$0xff] }
  0x5a   : > { %v636_v4 = vpack.c.bf16 %v282_v2, %v278_v1  ;;  %v668_v8 = vpack.c.bf16 %v284_v5, %v280_v3  ;;  %v638_v9 = vpack.c.bf16 %v281_v7, %v277_v6  ;;  %v279_v10 = vld [vmem:[%s1096_s25 + $0x10] sm:$0xff]  ;;  %v286_v12 = vld [vmem:[%s1096_s25 + $0x48] sm:$0xff]  ;;  %v288_v15 = vld [vmem:[%s1096_s25 + $0x58] sm:$0xff] }
  0x5b   : > { %v283_v11 = vld [vmem:[%s1096_s25 + $0x30] sm:$0xff]  ;;  %v290_v14 = vld [vmem:[%s1096_s25 + $0x68] sm:$0xff]  ;;  %v292_v16 = vld [vmem:[%s1096_s25 + $0x78] sm:$0xff] }
  0x5c   : > { %637 = vmatprep.subr.bf16.mxu0 %v636_v4  ;;  %v670_v13 = vpack.c.bf16 %v283_v11, %v279_v10  ;;  %669 = vmatprep.subr.bf16.mxu1 %v668_v8  ;;  %v640_v17 = vpack.c.bf16 %v290_v14, %v286_v12  ;;  %v672_v18 = vpack.c.bf16 %v292_v16, %v288_v15  ;;  %v285_v19 = vld [vmem:[%s1096_s25 + $0x40] sm:$0xff]  ;;  %v287_v21 = vld [vmem:[%s1096_s25 + $0x50] sm:$0xff]  ;;  %v294_v23 = vld [vmem:[%s1096_s25 + $0x88] sm:$0xff] }
  0x5d   : > { %639 = vmatpush1.bf16.xpose.msra.mxu0 %v638_v9  ;;  %v289_v20 = vld [vmem:[%s1096_s25 + $0x60] sm:$0xff]  ;;  %v291_v22 = vld [vmem:[%s1096_s25 + $0x70] sm:$0xff]  ;;  %v298_v24 = vld [vmem:[%s1096_s25 + $0xa8] sm:$0xff] }
  0x5e   : > { %671 = vmatpush1.bf16.xpose.msra.mxu1 %v670_v13  ;;  %641 = vmatprep.subr.bf16.mxu0 %v640_v17  ;;  %v296_v25 = vld [vmem:[%s1096_s25 + $0x98] sm:$0xff]  ;;  %v642_v27 = vpack.c.bf16 %v289_v20, %v285_v19  ;;  %v674_v28 = vpack.c.bf16 %v291_v22, %v287_v21  ;;  %v644_v29 = vpack.c.bf16 %v298_v24, %v294_v23  ;;  %v293_v31 = vld [vmem:[%s1096_s25 + $0x80] sm:$0xff]  ;;  %v295_v33 = vld [vmem:[%s1096_s25 + $0x90] sm:$0xff] }
  0x5f   : > { %673 = vmatprep.subr.bf16.mxu1 %v672_v18  ;;  %v300_v26 = vld [vmem:[%s1096_s25 + $0xb8] sm:$0xff]  ;;  %v297_v32 = vld [vmem:[%s1096_s25 + $0xa0] sm:$0xff]  ;;  %v299_v34 = vld [vmem:[%s1096_s25 + $0xb0] sm:$0xff] }
  0x60   : > { %v676_v30 = vpack.c.bf16 %v300_v26, %v296_v25  ;;  %v302_v35 = vld [vmem:[%s1096_s25 + $0xc8] sm:$0xff]  ;;  %v304_v37 = vld [vmem:[%s1096_s25 + $0xd8] sm:$0xff]  ;;  %v646_v39 = vpack.c.bf16 %v297_v32, %v293_v31  ;;  %v678_v40 = vpack.c.bf16 %v299_v34, %v295_v33  ;;  %v301_v43 = vld [vmem:[%s1096_s25 + $0xc0] sm:$0xff] }
  0x61   : > { %v306_v36 = vld [vmem:[%s1096_s25 + $0xe8] sm:$0xff]  ;;  %v308_v38 = vld [vmem:[%s1096_s25 + $0xf8] sm:$0xff]  ;;  %v305_v44 = vld [vmem:[%s1096_s25 + $0xe0] sm:$0xff] }
  0x62   : > { %v648_v41 = vpack.c.bf16 %v306_v36, %v302_v35  ;;  %v680_v42 = vpack.c.bf16 %v308_v38, %v304_v37  ;;  %v303_v45 = vld [vmem:[%s1096_s25 + $0xd0] sm:$0xff]  ;;  %v274_v46 = vld [vmem:[%s1090_s22 + $0x8] sm:$0xff]  ;;  %v276_v47 = vld [vmem:[%s1090_s22 + $0x18] sm:$0xff]  ;;  %v650_v53 = vpack.c.bf16 %v305_v44, %v301_v43 }
  0x63   : > { %v307_v48 = vld [vmem:[%s1096_s25 + $0xf0] sm:$0xff]  ;;  %v310_v49 = vld [vmem:[%s1096_s25 + $0x108] sm:$0xff]  ;;  %405 = vmatprep.mubr.f32.mxu0 %v274_v46  ;;  %v312_v51 = vld [vmem:[%s1096_s25 + $0x118] sm:$0xff]  ;;  %475 = vmatprep.mubr.f32.mxu1 %v276_v47 }
  0x64   : > { %v314_v50 = vld [vmem:[%s1096_s25 + $0x128] sm:$0xff]  ;;  %v316_v52 = vld [vmem:[%s1096_s25 + $0x138] sm:$0xff]  ;;  %v682_v54 = vpack.c.bf16 %v307_v48, %v303_v45  ;;  %v309_v57 = vld [vmem:[%s1096_s25 + $0x100] sm:$0xff] }
  0x65   : > { %643 = vmatpush1.bf16.xpose.msra.mxu0 %v642_v27  ;;  %v652_v55 = vpack.c.bf16 %v314_v50, %v310_v49  ;;  %v684_v56 = vpack.c.bf16 %v316_v52, %v312_v51  ;;  %v313_v58 = vld [vmem:[%s1096_s25 + $0x120] sm:$0xff]  ;;  %v311_v59 = vld [vmem:[%s1096_s25 + $0x110] sm:$0xff]  ;;  %v318_v61 = vld [vmem:[%s1096_s25 + $0x148] sm:$0xff] }
  0x66   : > { %675 = vmatpush1.bf16.xpose.msra.mxu1 %v674_v28  ;;  %645 = vmatprep.subr.bf16.mxu0 %v644_v29  ;;  %v315_v60 = vld [vmem:[%s1096_s25 + $0x130] sm:$0xff]  ;;  %v322_v62 = vld [vmem:[%s1096_s25 + $0x168] sm:$0xff]  ;;  %v320_v63 = vld [vmem:[%s1096_s25 + $0x158] sm:$0xff]  ;;  %v654_v1 = vpack.c.bf16 %v313_v58, %v309_v57 }
  0x67   : > { %677 = vmatprep.subr.bf16.mxu1 %v676_v30  ;;  %v324_v0 = vld [vmem:[%s1096_s25 + $0x178] sm:$0xff]  ;;  %v686_v2 = vpack.c.bf16 %v315_v60, %v311_v59  ;;  %v656_v3 = vpack.c.bf16 %v322_v62, %v318_v61  ;;  %v317_v5 = vld [vmem:[%s1096_s25 + $0x140] sm:$0xff]  ;;  %v319_v7 = vld [vmem:[%s1096_s25 + $0x150] sm:$0xff] }
  0x68   : > { %v688_v4 = vpack.c.bf16 %v324_v0, %v320_v63  ;;  %v321_v6 = vld [vmem:[%s1096_s25 + $0x160] sm:$0xff]  ;;  %v323_v8 = vld [vmem:[%s1096_s25 + $0x170] sm:$0xff]  ;;  %v326_v9 = vld [vmem:[%s1096_s25 + $0x188] sm:$0xff] }
  0x69   : > { %v330_v10 = vld [vmem:[%s1096_s25 + $0x1a8] sm:$0xff]  ;;  %v328_v11 = vld [vmem:[%s1096_s25 + $0x198] sm:$0xff]  ;;  %v658_v13 = vpack.c.bf16 %v321_v6, %v317_v5  ;;  %v690_v14 = vpack.c.bf16 %v323_v8, %v319_v7  ;;  %v325_v17 = vld [vmem:[%s1096_s25 + $0x180] sm:$0xff] }
  0x6a   : > { %v332_v12 = vld [vmem:[%s1096_s25 + $0x1b8] sm:$0xff]  ;;  %v660_v15 = vpack.c.bf16 %v330_v10, %v326_v9  ;;  %v329_v18 = vld [vmem:[%s1096_s25 + $0x1a0] sm:$0xff]  ;;  %v327_v19 = vld [vmem:[%s1096_s25 + $0x190] sm:$0xff] }
  0x6b   : > { %v692_v16 = vpack.c.bf16 %v332_v12, %v328_v11  ;;  %v331_v20 = vld [vmem:[%s1096_s25 + $0x1b0] sm:$0xff]  ;;  %v334_v21 = vld [vmem:[%s1096_s25 + $0x1c8] sm:$0xff]  ;;  %v336_v23 = vld [vmem:[%s1096_s25 + $0x1d8] sm:$0xff]  ;;  %v662_v25 = vpack.c.bf16 %v329_v18, %v325_v17 }
  0x6c   : > { %v338_v22 = vld [vmem:[%s1096_s25 + $0x1e8] sm:$0xff]  ;;  %v340_v24 = vld [vmem:[%s1096_s25 + $0x1f8] sm:$0xff]  ;;  %v694_v26 = vpack.c.bf16 %v331_v20, %v327_v19  ;;  %v333_v29 = vld [vmem:[%s1096_s25 + $0x1c0] sm:$0xff] }
  0x6d   : > { %647 = vmatpush1.bf16.xpose.msra.mxu0 %v646_v39  ;;  %v664_v27 = vpack.c.bf16 %v338_v22, %v334_v21  ;;  %v696_v28 = vpack.c.bf16 %v340_v24, %v336_v23  ;;  %v337_v30 = vld [vmem:[%s1096_s25 + $0x1e0] sm:$0xff]  ;;  %v335_v31 = vld [vmem:[%s1096_s25 + $0x1d0] sm:$0xff]  ;;  %v272_v38 = vld [vmem:[#allocation2] sm:$0xff] }
  0x6e   : > { %679 = vmatpush1.bf16.xpose.msra.mxu1 %v678_v40  ;;  %649 = vmatprep.subr.bf16.mxu0 %v648_v41  ;;  %v339_v32 = vld [vmem:[%s1096_s25 + $0x1f0] sm:$0xff]  ;;  %v666_v33 = vpack.c.bf16 %v337_v30, %v333_v29  ;;  %v273_v35 = vld [vmem:[%s1090_s22] sm:$0xff]  ;;  %v629_v45 = vld [vmem:[%s1223_s2] ss:$0 sm:$0xff] (!%p628_p11) }
  0x6f   : > { %681 = vmatprep.subr.bf16.mxu1 %v680_v42  ;;  %v698_v34 = vpack.c.bf16 %v339_v32, %v335_v31  ;;  %v275_v36 = vld [vmem:[%s1090_s22 + $0x10] sm:$0xff] }
  0x75   : > { %651 = vmatpush1.bf16.xpose.msra.mxu0 %v650_v53 }
  0x76   : > { %683 = vmatpush1.bf16.xpose.msra.mxu1 %v682_v54  ;;  %653 = vmatprep.subr.bf16.mxu0 %v652_v55 }
  0x77   : > { %685 = vmatprep.subr.bf16.mxu1 %v684_v56 }
  0x7d   : > { %655 = vmatpush1.bf16.xpose.msra.mxu0 %v654_v1 }
  0x7e   : > { %687 = vmatpush1.bf16.xpose.msra.mxu1 %v686_v2  ;;  %657 = vmatprep.subr.bf16.mxu0 %v656_v3 }
  0x7f   : > { %689 = vmatprep.subr.bf16.mxu1 %v688_v4 }
  0x85   : > { %659 = vmatpush1.bf16.xpose.msra.mxu0 %v658_v13 }
  0x86   : > { %691 = vmatpush1.bf16.xpose.msra.mxu1 %v690_v14  ;;  %661 = vmatprep.subr.bf16.mxu0 %v660_v15 }
  0x87   : > { %693 = vmatprep.subr.bf16.mxu1 %v692_v16 }
  0x8d   : > { %663 = vmatpush1.bf16.xpose.msra.mxu0 %v662_v25 }
  0x8e   : > { %695 = vmatpush1.bf16.xpose.msra.mxu1 %v694_v26  ;;  %665 = vmatprep.subr.bf16.mxu0 %v664_v27 }
  0x8f   : > { %697 = vmatprep.subr.bf16.mxu1 %v696_v28 }
  0x95   : > { %667 = vmatpush1.bf16.xpose.msra.mxu0 %v666_v33 }
  0x96   : > { %699 = vmatpush1.bf16.xpose.msra.mxu1 %v698_v34 }
  0x9c   : > { %406 = vmatmul.mubr.f32.vlgmr.msra.gmra.mrb[0].mxu0 %v273_v35 }
  0x9d   : > { %476 = vmatmul.mubr.f32.vlgmr.msra.gmra.mrb[0].mxu1 %v275_v36 }
 0x16f   : > { %v407_v37 = vpop.f32.mrb[0].mxu0  ;;  %486 = sbr.rel (%p628_p11) target bundleno = 386 (0x182), region = 48 }
 0x170   : > { %v477_v39 = vpop.f32.mrb[0].mxu1  ;;  %v409_v40 = vpop.f32.mrb[1].mxu0 }
 0x171   : > { %v478_v41 = vadd.f32 %v477_v39, %v407_v37  ;;  %v479_v42 = vpop.f32.mrb[1].mxu1 }
 0x173   : > { %v481_v43 = vadd.f32 %v478_v41, %v272_v38 }
 0x175   : > { %482 = vst [vmem:[#allocation2] sm:$0xff] %v481_v43 }
 0x17c   : > { %v487_v44 = vld [vmem:[#allocation2] sm:$0xff] }
 0x17d   : > { %v495_v46 = vadd.f32 %v629_v45, %v487_v44 }
 0x17f   : > { %v496_v47 = vmax.f32 %v495_v46, 0.0 }
 0x181   : > { %497 = vst [vmem:[#allocation8] sm:$0xff] %v496_v47 }
 0x182 PF: > { %p1177_p4 = scmp.eq.s32.totalorder %s614_s18, 1  ;;  %s923_s20 = smov [#allocation8]  }
 0x183   : > { %s508_s30 = sshll.u32 %s923_s20, 4  ;;  %s509_s30 = int_to_ptr.vmem [resolvable:$true] %s508_s30 }
 0x184   : > { %s831_s15 = scalar_lea.vmem %s509_s30, 128  ;;  %p838_p13 = scmp.lt.s32.totalorder %s509_s30, %s509_s30 }
 0x185   : > { %p832_p8 = scmp.ne.s32.totalorder %s509_s30, %s831_s15  ;;  %p839_p3 = scmp.lt.s32.totalorder %s831_s15, %s831_s15 }
 0x187   : > { %p833_p1 = pnand %p832_p8, %p1177_p4  ;;  %p840_p5 = por %p839_p3, %p838_p13 }
 0x189   : > { %p834_p2 = pneg %p833_p1 }
 0x18b   : > { %p841_p6 = pnand %p840_p5, %p834_p2 }
 0x18d   : > { %844 = shalt.err (!%p841_p6)
}
 0x18e   : > { %s845_s18 = scalar_lea.hbm %s1224_s3, 128 }
 0x18f   : > { %p846_p10 = scmp.ne.s32.totalorder %s1224_s3, %s845_s18  ;;  %p851_p7 = scmp.lt.u32.totalorder %s845_s18, %s1224_s3 }
 0x191   : > { %p847_p12 = pnand %p846_p10, %p1177_p4 }
 0x193   : > { %p848_p0 = pneg %p847_p12 }
 0x195   : > { %p853_p9 = pnand %p851_p7, %p848_p0 }
 0x197   : > { %856 = shalt.err (!%p853_p9)
}
 0x198   : > { %705 = dma.vmem_to_hbm [thread:$0]  (%p1177_p4), %s509_s30, 128, %s1224_s3, [#allocation5]  }
 0x199   : > { %890 = dma.done.wait (%p1177_p4), [#allocation5], 128  }
 0x19a   : > { %892 = vsyncadd (%p1177_p4), [#allocation5], 4294967168 }
 0x19b PF: > { %s20_s17 = sadd.s32 1, %s915_s17   ;;  %s1232_s12 = smov %s899_s13 }
 0x19c   : > { %p17_p11 = scmp.ge.s32.totalorder %s20_s17, 4   ;;  %s1233_s13 = smov %s903_s14 }
 0x19d   : > { %s1234_s14 = smov %s995_s24  ;;  %s1235_s15 = smov %s911_s16 }
 0x19e   : > { %s1236_s16 = smov %s1238_s19  ;;  %19 = sbr.rel (!%p17_p11) target bundleno = 7 (0x7), region = 94 }
 0x1a5   :  { %521 = vsyncpa [#allocation4], 1 }
 0x1a6   :  { %523 = vsyncpa [#allocation4 + $0x1], 1 }
 0x1a7   :  { %524 = vsyncpa [#allocation7], 1 }
 0x1a8   :  { %526 = vsyncpa [#allocation7 + $0x1], 1 }
 0x1a9   :  { %527 = vsyncpa [#allocation5], 1 }
 0x1aa   :  { %529 = vsyncpa [#allocation5 + $0x1], 1 }

</bundles_post_ra>
